<compile_context>
chip_gen: v6e
topology: v6e:2x2x1
jax: 0.10.0
libtpu: 0.0.40
codegen_flags: <defaults>
</compile_context>

<pallas_src>
import functools

import jax
import jax.numpy as jnp
from jax.experimental import pallas as pl
from jax.experimental.pallas import tpu as pltpu


def _ve_precond_kernel(sigma_ref,   # SMEM scalar-prefetch: (N,) f32
                       xp_ref,      # (1, C, FLAT)  zero-padded, flattened input (f32)
                       be_ref,      # (1, CH, 1)    per-sample (bias1 + noise emb) (f32)
                       w1_ref,      # (9, CH, C)    3x3 conv taps, transposed (bf16)
                       w2_ref,      # (C, CH)       1x1 conv, transposed (bf16)
                       b2_ref,      # (C, 1)        output bias (f32)
                       out_ref,     # (1, C, H*Wp)  lane-dense output slab (f32)
                       *, height, width):
    b = pl.program_id(0)
    sigma = sigma_ref[b]                      # c_out; c_skip = c_in = 1

    wp = width + 2                            # padded row width
    slab = height * wp                        # output slab width (on lanes)
    ch = w1_ref.shape[1]

    xp = xp_ref[0]                            # (C, FLAT) f32, loaded once

    # ---- 3x3 conv as 9 accumulated matmuls over shifted flat slices -------
    # h[c_out, o] = sum_{dy,dx,c} w1[dy,dx,c,c_out] * xpad[c, (y+dy)*Wp + (x+dx)]
    h = jnp.zeros((ch, slab), jnp.float32)
    for t in range(9):
        dy, dx = divmod(t, 3)
        off = dy * wp + dx
        xs = xp[:, off:off + slab].astype(jnp.bfloat16)          # (C, slab)
        h = h + jnp.dot(w1_ref[t], xs,                           # (CH, slab) f32
                        preferred_element_type=jnp.float32)

    # bias + per-sample noise embedding, SiLU (kept in f32 for v5e)
    h = h + be_ref[0]                          # (CH, 1) lane-broadcast
    h = h * jax.nn.sigmoid(h)

    # 1x1 conv back to image channels: F_x^T, (C, slab)
    f = jnp.dot(w2_ref[...], h.astype(jnp.bfloat16),
                preferred_element_type=jnp.float32) + b2_ref[...]

    # skip path: x itself is exactly the center-tap slice of the padded input
    skip = xp[:, wp + 1: wp + 1 + slab]        # (C, slab) f32, exact f32 x

    # VE preconditioning: D_x = c_skip * x + c_out * F_x
    out_ref[0] = skip + sigma * f


def init_params(key, img_channels, hidden, n_freq=16):
    kc1, kc2, ke = jax.random.split(key, 3)
    C, CH = img_channels, hidden
    w1 = jax.random.normal(kc1, (3, 3, C, CH), jnp.float32) / jnp.sqrt(9.0 * C)
    b1 = jnp.zeros((CH,), jnp.float32)
    w2 = jax.random.normal(kc2, (CH, C), jnp.float32) / jnp.sqrt(1.0 * CH)
    b2 = jnp.zeros((C,), jnp.float32)
    w_emb = jax.random.normal(ke, (2 * n_freq, CH), jnp.float32) / jnp.sqrt(2.0 * n_freq)
    b_emb = jnp.zeros((CH,), jnp.float32)
    return dict(w1=w1, b1=b1, w2=w2, b2=b2, w_emb=w_emb, b_emb=b_emb, n_freq=n_freq)


def ve_precond(x_nchw, sigma, params):
    """Forward pass of VEPrecond.  x_nchw: (N, C, H, W), sigma: (N,), scalar or float."""
    x = jnp.asarray(x_nchw, jnp.float32)
    N, C, H, W = x.shape
    CH = params["w1"].shape[-1]

    wp = W + 2
    slab = H * wp                                   # kernel output width (lanes)
    # flat input length: max tap offset (2*wp+2) + slab, rounded up to lanes
    flat = ((2 * wp + 2 + slab) + 127) // 128 * 128

    sigma = jnp.broadcast_to(
        jnp.reshape(jnp.asarray(sigma, jnp.float32), (-1,)), (N,))

    # ---- glue: preconditioning coefficient + tiny per-sample noise embedding
    c_noise = jnp.log(0.5 * sigma)                                      # (N,)
    freqs = jnp.arange(1, params["n_freq"] + 1, dtype=jnp.float32)
    feats = jnp.concatenate([jnp.cos(c_noise[:, None] * freqs),
                             jnp.sin(c_noise[:, None] * freqs)], axis=-1)
    emb = jax.nn.silu(feats @ params["w_emb"] + params["b_emb"])        # (N, CH)
    bias_emb = (emb + params["b1"][None, :]).reshape(N, CH, 1)          # f32

    # ---- NCHW stays NCHW: zero-pad spatially, flatten, pad tail to lane multiple
    xpad = jnp.pad(x, ((0, 0), (0, 0), (1, 1), (1, 1)))                 # (N, C, H+2, W+2)
    xpad = xpad.reshape(N, C, (H + 2) * wp)
    xpad = jnp.pad(xpad, ((0, 0), (0, 0), (0, flat - (H + 2) * wp)))    # (N, C, flat)

    # weights: tap-major transposed layout, bf16 operands for the MXU
    w1_taps = (params["w1"].reshape(9, C, CH)
               .transpose(0, 2, 1).astype(jnp.bfloat16))                # (9, CH, C)
    w2_t = params["w2"].T.astype(jnp.bfloat16)                          # (C, CH)
    b2 = params["b2"].reshape(C, 1).astype(jnp.float32)                 # (C, 1)

    kernel = functools.partial(_ve_precond_kernel, height=H, width=W)

    grid_spec = pltpu.PrefetchScalarGridSpec(
        num_scalar_prefetch=1,                  # sigma -> SMEM
        grid=(N,),
        in_specs=[
            pl.BlockSpec((1, C, flat),  lambda b, sig: (b, 0, 0)),
            pl.BlockSpec((1, CH, 1),    lambda b, sig: (b, 0, 0)),
            # weights/biases are grid-invariant (tiny; single-buffering them
            # only matters once HW-tiled blocks make VMEM tight, e.g. on v7x)
            pl.BlockSpec((9, CH, C),    lambda b, sig: (0, 0, 0)),
            pl.BlockSpec((C, CH),       lambda b, sig: (0, 0)),
            pl.BlockSpec((C, 1),        lambda b, sig: (0, 0)),
        ],
        out_specs=pl.BlockSpec((1, C, slab), lambda b, sig: (b, 0, 0)),
    )

    out_slab = pl.pallas_call(
        kernel,
        out_shape=jax.ShapeDtypeStruct((N, C, slab), jnp.float32),
        grid_spec=grid_spec,
        compiler_params=pltpu.CompilerParams(
            dimension_semantics=("parallel",)),
    )(sigma, xpad, bias_emb, w1_taps, w2_t, b2)

    # drop the 2 garbage columns per padded row; stays NCHW throughout
    return out_slab.reshape(N, C, H, wp)[:, :, :, :W]


if __name__ == "__main__":
    key = jax.random.PRNGKey(0)
    k_x, k_s, k_p = jax.random.split(key, 3)

    N, C, H, W, HIDDEN = 2, 4, 16, 16, 32   # img_resolution=16, img_channels=4
    x = jax.random.normal(k_x, (N, C, H, W), jnp.float32)
    sigma = jnp.exp(jax.random.uniform(
        k_s, (N,), jnp.float32,
        minval=jnp.log(0.02), maxval=jnp.log(100.0)))   # sigma_min/sigma_max range

    params = init_params(k_p, C, HIDDEN)

    out = ve_precond(x, sigma, params)
    out = jax.block_until_ready(out)
    assert out.shape == (N, C, H, W)
    assert out.dtype == jnp.float32
    assert bool(jnp.all(jnp.isfinite(out)))
    print("KERNEL_OK")
</pallas_src>

<mosaic_0001>
module attributes {stable_mosaic.version = 11 : i64} {
  func.func @_ve_precond_kernel(%arg0: i32, %arg1: memref<2xf32, #tpu.memory_space<smem>>, %arg2: memref<1x4x384xf32, #tpu.memory_space<vmem>>, %arg3: memref<1x32x1xf32, #tpu.memory_space<vmem>>, %arg4: memref<9x32x4xbf16, #tpu.memory_space<vmem>>, %arg5: memref<4x32xbf16, #tpu.memory_space<vmem>>, %arg6: memref<4x1xf32, #tpu.memory_space<vmem>>, %arg7: memref<1x4x288xf32, #tpu.memory_space<vmem>>) attributes {dimension_semantics = [#tpu.dimension_semantics<parallel>], iteration_bounds = array<i64: 2>, scalar_prefetch = 1 : i64, scratch_operands = 0 : i64, tpu.core_type = #tpu.core_type<tc>, window_params = [{transform_indices = @transform_0, window_bounds = array<i64: 1, 4, 384>}, {transform_indices = @transform_1, window_bounds = array<i64: 1, 32, 1>}, {pipeline_mode = #tpu.pipeline_mode<synchronous>, transform_indices = @transform_2, window_bounds = array<i64: 9, 32, 4>}, {pipeline_mode = #tpu.pipeline_mode<synchronous>, transform_indices = @transform_3, window_bounds = array<i64: 4, 32>}, {pipeline_mode = #tpu.pipeline_mode<synchronous>, transform_indices = @transform_4, window_bounds = array<i64: 4, 1>}, {transform_indices = @transform_5, window_bounds = array<i64: 1, 4, 288>}]} {
    %0 = arith.index_cast %arg0 : i32 to index
    %1 = memref.load %arg1[%0] : memref<2xf32, #tpu.memory_space<smem>>
    %c0 = arith.constant 0 : index
    %c0_0 = arith.constant 0 : index
    %c0_1 = arith.constant 0 : index
    %2 = vector.load %arg2[%c0, %c0_0, %c0_1] : memref<1x4x384xf32, #tpu.memory_space<vmem>>, vector<1x4x384xf32>
    %3 = vector.shape_cast %2 : vector<1x4x384xf32> to vector<4x384xf32>
    %cst = arith.constant 0.000000e+00 : f32
    %4 = vector.broadcast %cst : f32 to vector<32x288xf32>
    %5 = vector.extract_strided_slice %3 {offsets = [0, 0], sizes = [4, 288], strides = [1, 1]} : vector<4x384xf32> to vector<4x288xf32>
    %6 = arith.truncf %5 : vector<4x288xf32> to vector<4x288xbf16>
    %c0_2 = arith.constant 0 : index
    %c0_3 = arith.constant 0 : index
    %c0_4 = arith.constant 0 : index
    %7 = vector.load %arg4[%c0_2, %c0_3, %c0_4] : memref<9x32x4xbf16, #tpu.memory_space<vmem>>, vector<1x32x4xbf16>
    %8 = vector.shape_cast %7 : vector<1x32x4xbf16> to vector<32x4xbf16>
    %cst_5 = arith.constant dense<0.000000e+00> : vector<32x288xf32>
    %9 = tpu.matmul %8, %6, %cst_5 {dimension_numbers = #tpu.dot_dimension_numbers<[1], [0], [0], [1], [0, 0, 1, 1], [], []>} : vector<32x4xbf16>, vector<4x288xbf16>, vector<32x288xf32> -> vector<32x288xf32>
    %10 = arith.addf %4, %9 : vector<32x288xf32>
    %11 = vector.extract_strided_slice %3 {offsets = [0, 1], sizes = [4, 288], strides = [1, 1]} : vector<4x384xf32> to vector<4x288xf32>
    %12 = arith.truncf %11 : vector<4x288xf32> to vector<4x288xbf16>
    %c1 = arith.constant 1 : index
    %c0_6 = arith.constant 0 : index
    %c0_7 = arith.constant 0 : index
    %13 = vector.load %arg4[%c1, %c0_6, %c0_7] : memref<9x32x4xbf16, #tpu.memory_space<vmem>>, vector<1x32x4xbf16>
    %14 = vector.shape_cast %13 : vector<1x32x4xbf16> to vector<32x4xbf16>
    %cst_8 = arith.constant dense<0.000000e+00> : vector<32x288xf32>
    %15 = tpu.matmul %14, %12, %cst_8 {dimension_numbers = #tpu.dot_dimension_numbers<[1], [0], [0], [1], [0, 0, 1, 1], [], []>} : vector<32x4xbf16>, vector<4x288xbf16>, vector<32x288xf32> -> vector<32x288xf32>
    %16 = arith.addf %10, %15 : vector<32x288xf32>
    %17 = vector.extract_strided_slice %3 {offsets = [0, 2], sizes = [4, 288], strides = [1, 1]} : vector<4x384xf32> to vector<4x288xf32>
    %18 = arith.truncf %17 : vector<4x288xf32> to vector<4x288xbf16>
    %c2 = arith.constant 2 : index
    %c0_9 = arith.constant 0 : index
    %c0_10 = arith.constant 0 : index
    %19 = vector.load %arg4[%c2, %c0_9, %c0_10] : memref<9x32x4xbf16, #tpu.memory_space<vmem>>, vector<1x32x4xbf16>
    %20 = vector.shape_cast %19 : vector<1x32x4xbf16> to vector<32x4xbf16>
    %cst_11 = arith.constant dense<0.000000e+00> : vector<32x288xf32>
    %21 = tpu.matmul %20, %18, %cst_11 {dimension_numbers = #tpu.dot_dimension_numbers<[1], [0], [0], [1], [0, 0, 1, 1], [], []>} : vector<32x4xbf16>, vector<4x288xbf16>, vector<32x288xf32> -> vector<32x288xf32>
    %22 = arith.addf %16, %21 : vector<32x288xf32>
    %23 = vector.extract_strided_slice %3 {offsets = [0, 18], sizes = [4, 288], strides = [1, 1]} : vector<4x384xf32> to vector<4x288xf32>
    %24 = arith.truncf %23 : vector<4x288xf32> to vector<4x288xbf16>
    %c3 = arith.constant 3 : index
    %c0_12 = arith.constant 0 : index
    %c0_13 = arith.constant 0 : index
    %25 = vector.load %arg4[%c3, %c0_12, %c0_13] : memref<9x32x4xbf16, #tpu.memory_space<vmem>>, vector<1x32x4xbf16>
    %26 = vector.shape_cast %25 : vector<1x32x4xbf16> to vector<32x4xbf16>
    %cst_14 = arith.constant dense<0.000000e+00> : vector<32x288xf32>
    %27 = tpu.matmul %26, %24, %cst_14 {dimension_numbers = #tpu.dot_dimension_numbers<[1], [0], [0], [1], [0, 0, 1, 1], [], []>} : vector<32x4xbf16>, vector<4x288xbf16>, vector<32x288xf32> -> vector<32x288xf32>
    %28 = arith.addf %22, %27 : vector<32x288xf32>
    %29 = vector.extract_strided_slice %3 {offsets = [0, 19], sizes = [4, 288], strides = [1, 1]} : vector<4x384xf32> to vector<4x288xf32>
    %30 = arith.truncf %29 : vector<4x288xf32> to vector<4x288xbf16>
    %c4 = arith.constant 4 : index
    %c0_15 = arith.constant 0 : index
    %c0_16 = arith.constant 0 : index
    %31 = vector.load %arg4[%c4, %c0_15, %c0_16] : memref<9x32x4xbf16, #tpu.memory_space<vmem>>, vector<1x32x4xbf16>
    %32 = vector.shape_cast %31 : vector<1x32x4xbf16> to vector<32x4xbf16>
    %cst_17 = arith.constant dense<0.000000e+00> : vector<32x288xf32>
    %33 = tpu.matmul %32, %30, %cst_17 {dimension_numbers = #tpu.dot_dimension_numbers<[1], [0], [0], [1], [0, 0, 1, 1], [], []>} : vector<32x4xbf16>, vector<4x288xbf16>, vector<32x288xf32> -> vector<32x288xf32>
    %34 = arith.addf %28, %33 : vector<32x288xf32>
    %35 = vector.extract_strided_slice %3 {offsets = [0, 20], sizes = [4, 288], strides = [1, 1]} : vector<4x384xf32> to vector<4x288xf32>
    %36 = arith.truncf %35 : vector<4x288xf32> to vector<4x288xbf16>
    %c5 = arith.constant 5 : index
    %c0_18 = arith.constant 0 : index
    %c0_19 = arith.constant 0 : index
    %37 = vector.load %arg4[%c5, %c0_18, %c0_19] : memref<9x32x4xbf16, #tpu.memory_space<vmem>>, vector<1x32x4xbf16>
    %38 = vector.shape_cast %37 : vector<1x32x4xbf16> to vector<32x4xbf16>
    %cst_20 = arith.constant dense<0.000000e+00> : vector<32x288xf32>
    %39 = tpu.matmul %38, %36, %cst_20 {dimension_numbers = #tpu.dot_dimension_numbers<[1], [0], [0], [1], [0, 0, 1, 1], [], []>} : vector<32x4xbf16>, vector<4x288xbf16>, vector<32x288xf32> -> vector<32x288xf32>
    %40 = arith.addf %34, %39 : vector<32x288xf32>
    %41 = vector.extract_strided_slice %3 {offsets = [0, 36], sizes = [4, 288], strides = [1, 1]} : vector<4x384xf32> to vector<4x288xf32>
    %42 = arith.truncf %41 : vector<4x288xf32> to vector<4x288xbf16>
    %c6 = arith.constant 6 : index
    %c0_21 = arith.constant 0 : index
    %c0_22 = arith.constant 0 : index
    %43 = vector.load %arg4[%c6, %c0_21, %c0_22] : memref<9x32x4xbf16, #tpu.memory_space<vmem>>, vector<1x32x4xbf16>
    %44 = vector.shape_cast %43 : vector<1x32x4xbf16> to vector<32x4xbf16>
    %cst_23 = arith.constant dense<0.000000e+00> : vector<32x288xf32>
    %45 = tpu.matmul %44, %42, %cst_23 {dimension_numbers = #tpu.dot_dimension_numbers<[1], [0], [0], [1], [0, 0, 1, 1], [], []>} : vector<32x4xbf16>, vector<4x288xbf16>, vector<32x288xf32> -> vector<32x288xf32>
    %46 = arith.addf %40, %45 : vector<32x288xf32>
    %47 = vector.extract_strided_slice %3 {offsets = [0, 37], sizes = [4, 288], strides = [1, 1]} : vector<4x384xf32> to vector<4x288xf32>
    %48 = arith.truncf %47 : vector<4x288xf32> to vector<4x288xbf16>
    %c7 = arith.constant 7 : index
    %c0_24 = arith.constant 0 : index
    %c0_25 = arith.constant 0 : index
    %49 = vector.load %arg4[%c7, %c0_24, %c0_25] : memref<9x32x4xbf16, #tpu.memory_space<vmem>>, vector<1x32x4xbf16>
    %50 = vector.shape_cast %49 : vector<1x32x4xbf16> to vector<32x4xbf16>
    %cst_26 = arith.constant dense<0.000000e+00> : vector<32x288xf32>
    %51 = tpu.matmul %50, %48, %cst_26 {dimension_numbers = #tpu.dot_dimension_numbers<[1], [0], [0], [1], [0, 0, 1, 1], [], []>} : vector<32x4xbf16>, vector<4x288xbf16>, vector<32x288xf32> -> vector<32x288xf32>
    %52 = arith.addf %46, %51 : vector<32x288xf32>
    %53 = vector.extract_strided_slice %3 {offsets = [0, 38], sizes = [4, 288], strides = [1, 1]} : vector<4x384xf32> to vector<4x288xf32>
    %54 = arith.truncf %53 : vector<4x288xf32> to vector<4x288xbf16>
    %c8 = arith.constant 8 : index
    %c0_27 = arith.constant 0 : index
    %c0_28 = arith.constant 0 : index
    %55 = vector.load %arg4[%c8, %c0_27, %c0_28] : memref<9x32x4xbf16, #tpu.memory_space<vmem>>, vector<1x32x4xbf16>
    %56 = vector.shape_cast %55 : vector<1x32x4xbf16> to vector<32x4xbf16>
    %cst_29 = arith.constant dense<0.000000e+00> : vector<32x288xf32>
    %57 = tpu.matmul %56, %54, %cst_29 {dimension_numbers = #tpu.dot_dimension_numbers<[1], [0], [0], [1], [0, 0, 1, 1], [], []>} : vector<32x4xbf16>, vector<4x288xbf16>, vector<32x288xf32> -> vector<32x288xf32>
    %58 = arith.addf %52, %57 : vector<32x288xf32>
    %c0_30 = arith.constant 0 : index
    %c0_31 = arith.constant 0 : index
    %c0_32 = arith.constant 0 : index
    %59 = vector.load %arg3[%c0_30, %c0_31, %c0_32] : memref<1x32x1xf32, #tpu.memory_space<vmem>>, vector<1x32x1xf32>
    %60 = vector.shape_cast %59 : vector<1x32x1xf32> to vector<32x1xf32>
    %61 = vector.broadcast %60 : vector<32x1xf32> to vector<32x288xf32>
    %62 = arith.addf %58, %61 : vector<32x288xf32>
    %63 = arith.negf %62 : vector<32x288xf32>
    %64 = math.exp %63 : vector<32x288xf32>
    %cst_33 = arith.constant 1.000000e+00 : f32
    %65 = vector.broadcast %cst_33 : f32 to vector<32x288xf32>
    %66 = arith.addf %65, %64 : vector<32x288xf32>
    %67 = arith.divf %65, %66 : vector<32x288xf32>
    %68 = arith.mulf %62, %67 : vector<32x288xf32>
    %c0_34 = arith.constant 0 : index
    %c0_35 = arith.constant 0 : index
    %69 = vector.load %arg5[%c0_34, %c0_35] : memref<4x32xbf16, #tpu.memory_space<vmem>>, vector<4x32xbf16>
    %70 = arith.truncf %68 : vector<32x288xf32> to vector<32x288xbf16>
    %cst_36 = arith.constant dense<0.000000e+00> : vector<4x288xf32>
    %71 = tpu.matmul %69, %70, %cst_36 {dimension_numbers = #tpu.dot_dimension_numbers<[1], [0], [0], [1], [0, 0, 1, 1], [], []>} : vector<4x32xbf16>, vector<32x288xbf16>, vector<4x288xf32> -> vector<4x288xf32>
    %c0_37 = arith.constant 0 : index
    %c0_38 = arith.constant 0 : index
    %72 = vector.load %arg6[%c0_37, %c0_38] : memref<4x1xf32, #tpu.memory_space<vmem>>, vector<4x1xf32>
    %73 = vector.broadcast %72 : vector<4x1xf32> to vector<4x288xf32>
    %74 = arith.addf %71, %73 : vector<4x288xf32>
    %75 = vector.extract_strided_slice %3 {offsets = [0, 19], sizes = [4, 288], strides = [1, 1]} : vector<4x384xf32> to vector<4x288xf32>
    %76 = vector.broadcast %1 : f32 to vector<4x288xf32>
    %77 = arith.mulf %76, %74 : vector<4x288xf32>
    %78 = arith.addf %75, %77 : vector<4x288xf32>
    %c0_39 = arith.constant 0 : index
    %c0_40 = arith.constant 0 : index
    %c0_41 = arith.constant 0 : index
    %79 = vector.load %arg7[%c0_39, %c0_40, %c0_41] : memref<1x4x288xf32, #tpu.memory_space<vmem>>, vector<1x4x288xf32>
    %80 = vector.shape_cast %79 : vector<1x4x288xf32> to vector<4x288xf32>
    %81 = vector.shape_cast %78 : vector<4x288xf32> to vector<1x4x288xf32>
    tpu.vector_store %arg7[%c0_39, %c0_40, %c0_41], %81 {strides = array<i32>} : memref<1x4x288xf32, #tpu.memory_space<vmem>>, vector<1x4x288xf32>,
    return
  }
  func.func @transform_0(%arg0: i32, %arg1: memref<2xf32, #tpu.memory_space<smem>>) -> (i32, i32, i32) {
    %c0_i32 = arith.constant 0 : i32
    %c0_i32_0 = arith.constant 0 : i32
    %c0_i32_1 = arith.constant 0 : i32
    return %arg0, %c0_i32, %c0_i32_0 : i32, i32, i32
  }
  func.func @transform_1(%arg0: i32, %arg1: memref<2xf32, #tpu.memory_space<smem>>) -> (i32, i32, i32) {
    %c0_i32 = arith.constant 0 : i32
    %c0_i32_0 = arith.constant 0 : i32
    %c0_i32_1 = arith.constant 0 : i32
    return %arg0, %c0_i32, %c0_i32_0 : i32, i32, i32
  }
  func.func @transform_2(%arg0: i32, %arg1: memref<2xf32, #tpu.memory_space<smem>>) -> (i32, i32, i32) {
    %c0_i32 = arith.constant 0 : i32
    %c0_i32_0 = arith.constant 0 : i32
    %c0_i32_1 = arith.constant 0 : i32
    %c0_i32_2 = arith.constant 0 : i32
    return %c0_i32, %c0_i32_0, %c0_i32_1 : i32, i32, i32
  }
  func.func @transform_3(%arg0: i32, %arg1: memref<2xf32, #tpu.memory_space<smem>>) -> (i32, i32) {
    %c0_i32 = arith.constant 0 : i32
    %c0_i32_0 = arith.constant 0 : i32
    %c0_i32_1 = arith.constant 0 : i32
    return %c0_i32, %c0_i32_0 : i32, i32
  }
  func.func @transform_4(%arg0: i32, %arg1: memref<2xf32, #tpu.memory_space<smem>>) -> (i32, i32) {
    %c0_i32 = arith.constant 0 : i32
    %c0_i32_0 = arith.constant 0 : i32
    %c0_i32_1 = arith.constant 0 : i32
    return %c0_i32, %c0_i32_0 : i32, i32
  }
  func.func @transform_5(%arg0: i32, %arg1: memref<2xf32, #tpu.memory_space<smem>>) -> (i32, i32, i32) {
    %c0_i32 = arith.constant 0 : i32
    %c0_i32_0 = arith.constant 0 : i32
    %c0_i32_1 = arith.constant 0 : i32
    return %arg0, %c0_i32, %c0_i32_0 : i32, i32, i32
  }
}

</mosaic_0001>

<bundles_post_ra>
// kernel: tpu_custom_call.1
= control target key start
LH: loop header
LB: loop body
LE: loop exit
PB: predicated region body
PF: predicated region fallthrough
CT: control target
= control target key end

     0   :  { %s2916_s0 = inlined_call_operand.vmem [shape: f32[2], index: 0, kind: input, shape index: {}]   ;;  %s2917_s1 = inlined_call_operand.vmem [shape: f32[2,4,384], index: 1, kind: input, shape index: {}]   ;;  %s2918_s2 = inlined_call_operand.vmem [shape: f32[2,32,1], index: 2, kind: input, shape index: {}]   ;;  %s2919_s3 = inlined_call_operand.vmem [shape: bf16[9,32,4], index: 3, kind: input, shape index: {}]   ;;  %s2920_s4 = inlined_call_operand.vmem [shape: bf16[4,32], index: 4, kind: input, shape index: {}]   ;;  %s2921_s5 = inlined_call_operand.vmem [shape: f32[4,1], index: 5, kind: input, shape index: {}]   ;;  %s2922_s6 = inlined_call_operand.hbm [shape: f32[2,4,288], index: 6, kind: output, shape index: {}]  }
   0x1   :  { %s11_s23 = sshll.u32 %s2916_s0, 4  ;;  %s12_s23 = int_to_ptr.vmem [resolvable:$true] %s11_s23 }
   0x2   :  { %s2296_s24 = scalar_lea.vmem %s12_s23, 16  ;;  %p2301_p1 = scmp.lt.s32.totalorder %s12_s23, %s12_s23 }
   0x3   :  { %p2297_p0 = scmp.ne.s32.totalorder %s12_s23, %s2296_s24  ;;  %p2302_p2 = scmp.lt.s32.totalorder %s2296_s24, %s2296_s24 }
   0x5   :  { %p2303_p3 = por %p2302_p2, %p2301_p1 }
   0x7   :  { %p2304_p4 = pnand %p2303_p3, %p2297_p0 }
   0x9   :  { %2307 = shalt.err (!%p2304_p4)  }
   0xa   :  { %s2372_s25 = smov [#allocation3]  }
   0xb   :  { %14 = dma.vmem_to_smem %s12_s23, 16, %s2372_s25, [#allocation2] }
   0xc   :  { %2350 = dma.done.wait [#allocation2], 16 }
   0xd   :  { %2351 = vsyncadd [#allocation2], 4294967280 }
   0xe   :  { %16 = sfence }
   0xf   :  { %17 = vsyncpa [#allocation5], 0 }
  0x10   :  { %19 = vsyncpa [#allocation5 + $0x1], 0  ;;  %s2424_s26 = smov 0   ;;  %s2426_s27 = smov 0  }
  0x11   :  { %s2428_s0 = smov 0   ;;  %s2430_s28 = smov 0  }
  0x12 LB: > { %s2445_s29 = sadd.s32 4294967295, %s2370_s28   ;;  %s1949_s30 = sadd.s32 4294967294, %s2370_s28   ;;  %s2370_s28 = sphi %s2430_s28, %s2942_s28   ;;  %s2366_s0 = sphi %s2428_s0, %s2941_s0   ;;  %s2362_s27 = sphi %s2426_s27, %s2940_s27   ;;  %s2358_s26 = sphi %s2424_s26, %s2939_s26  }
  0x13   : > { %s2449_s7 = sadd.s32 1, %s2370_s28   ;;  %s147_s8 = sadd.s32 1, %s2366_s0 }
  0x14   : > { %s144_s9 = ssub.s32 %s2370_s28, %s2449_s7  ;;  %p157_p5 = scmp.ne.s32.totalorder %s2366_s0, %s2362_s27 }
  0x15   : > { %p145_p6 = scmp.eq.s32.totalorder %s144_s9, 0  ;;  %p158_p7 = scmp.eq.s32.totalorder %s2445_s29, 1 }
  0x16   : > { %p163_p8 = scmp.ne.s32.totalorder %s2362_s27, %s2358_s26  ;;  %p164_p9 = scmp.eq.s32.totalorder %s1949_s30, 1 }
  0x17   : > { %s2460_s10 = scalar_select %p145_p6, %s2366_s0, %s147_s8  }
  0x18   : > { %p2462_p10 = por %p158_p7, %p157_p5  ;;  %p2466_p11 = por %p164_p9, %p163_p8 }
  0x19   : > { %p1952_p12 = scmp.ge.s32.totalorder %s2370_s28, 1  ;;  %p207_p13 = scmp.lt.s32.totalorder %s2370_s28, 3 }
  0x1b   : > { %p208_p0 = pnand %p1952_p12, %p207_p13 }
  0x1d   : > { %211 = sbr.rel (%p208_p0) target bundleno = 972 (0x3cc), region = 40 }
  0x22   : > { %p240_p1 = scmp.lt.s32.totalorder %s2445_s29, 1  ;;  %v2476_v0 = vld [vmem:[%s2919_s3 + $0x10] sm:$0xff]   ;;  %vm291_vm0 = vcmask 31744   ;;  %v2373_v1 = vmov 0   ;;  %s2374_s20 = smov 127   ;;  %vm298_vm1 = vcmask 1041408  }
  0x23   : > { %2101 = vmatprep.mubr.msk.bf16.mxu1 %vm291_vm0, %v2476_v0  ;;  %340 = vmatprep.mubr.bf16.mxu0 %v2373_v1  ;;  %s2375_s21 = smov 126   ;;  %s2376_s22 = smov 110   ;;  %v1735_v12 = vld [vmem:[%s2921_s5] sm:$0xf]  ;;  %v2229_v16 = vld [vmem:[%s2919_s3 + $0x18] sm:$0xff]   ;;  %vm288_vm2 = vcmask 1039360  }
  0x24   : > { %s2479_s15 = scalar_select %p240_p1, %s2445_s29, 1  ;;  %2226 = vset.pattern.permute.xlu1 %v2373_v1  ;;  %2225 = vset.pattern.permute.xlu0 %v2373_v1  ;;  %vm558_vm3 = vcmask 1031168   ;;  %v2230_v26 = vld [vmem:[%s2919_s3] sm:$0xff]   ;;  %vm711_vm4 = vcmask 900096   ;;  %v2231_v31 = vld [vmem:[%s2919_s3 + $0x8] sm:$0xff]   ;;  %vm864_vm5 = vcmask 891904  }
  0x25   : > { %s2377_s23 = smov 109   ;;  %s2378_s24 = smov 108   ;;  %v2232_v33 = vld [vmem:[%s2919_s3 + $0x20] sm:$0xff]   ;;  %v2233_v40 = vld [vmem:[%s2919_s3 + $0x28] sm:$0xff]   ;;  %v2234_v45 = vld [vmem:[%s2919_s3 + $0x30] sm:$0xff]   ;;  %vm1017_vm6 = vcmask 883712  }
  0x26   : > { %s2171_s16 = smul.u32 12, %s2479_s15  ;;  %s2379_s25 = smov 92   ;;  %v2235_v50 = vld [vmem:[%s2919_s3 + $0x38] sm:$0xff]   ;;  %v2236_v51 = vld [vmem:[%s2919_s3 + $0x40] sm:$0xff]   ;;  %v2237_v58 = vld [vmem:[%s2919_s3 + $0x48] sm:$0xff]   ;;  %vm1170_vm7 = vcmask 752640  }
  0x27   : > { %s2380_s30 = smov 91   ;;  %s2381_s8 = smov 90   ;;  %v2238_v63 = vld [vmem:[%s2919_s3 + $0x50] sm:$0xff]   ;;  %vm1323_vm8 = vcmask 744448   ;;  %vm1476_vm9 = vcmask 736256   ;;  %vm2383_vm10 = vmmov 0  }
  0x28   : > { %s2490_s19 = scalar_lea.vmem %s2917_s1, %s2171_s16  ;;  %s2068_s9 = sshll.u32 %s2479_s15, 5  ;;  %vm1741_vm11 = vcmask 261120   ;;  %vm1839_vm12 = vcmask 154624   ;;  %vm1861_vm13 = vcmask 257024   ;;  %vm1854_vm14 = vcmask 1043456  }
  0x29   : > { %v253_v2 = vld [vmem:[%s2490_s19 + $0x8] sm:$0xf]  ;;  %v252_v3 = vld [vmem:[%s2490_s19] sm:$0xff]  ;;  %s249_s16 = scalar_lea.vmem %s2918_s2, %s2068_s9  ;;  %s251_s9 = sld [smem:[#allocation3 + %s2445_s29]] }
  0x2a   : > { %v2494_v4 = vpack.c.bf16 %v253_v2, %v253_v2  ;;  %v257_v5 = vpack.c.bf16 %v252_v3, %v252_v3  ;;  %v255_v6 = vcombine.high %v252_v3, %v252_v3  ;;  %v1611_v8 = vld [vmem:[%s249_s16 + $0x18] sm:$0xff]  ;;  %v1610_v9 = vld [vmem:[%s249_s16 + $0x10] sm:$0xff]  ;;  %v1608_v10 = vld [vmem:[%s249_s16] sm:$0xff]  ;;  %s2384_s13 = smov 19   ;;  %s237_s14 = sand.u32 1, %s2362_s27  }
  0x2b   : > { %v1609_v11 = vld [vmem:[%s249_s16 + $0x8] sm:$0xff]  ;;  %s2170_s16 = smul.u32 12, %s237_s14 }
  0x2c   : > { %286 = vrot.lane.b32.xlu1 %v2494_v4, %s2374_s20  ;;  %282 = vrot.lane.b32.xlu0 %v257_v5, %s2374_s20  ;;  %v258_v7 = vpack.c.bf16 %v255_v6, %v255_v6  ;;  %v427_v17 = vsel %vm298_vm1, %v257_v5, 0  ;;  %v433_v23 = vsel %vm298_vm1, %v2494_v4, 0  ;;  %v2240_v6 = vld [vmem:[%s2919_s3 + $0x60] sm:$0xff]   ;;  %s2172_s17 = smul.u32 192, %s2445_s29  ;;  %s1864_s29 = scalar_lea.sflag [#allocation5], %s237_s14 }
  0x2d   : > { %s239_s18 = scalar_lea.vmem [#allocation4], %s2170_s16 }
  0x2e   : > { %s1878_s15 = sshll.u32 %s239_s18, 4  ;;  %s1879_s15 = int_to_ptr.vmem [resolvable:$true] %s1878_s15 }
  0x30   : > { %284 = vrot.lane.b32.xlu0 %v258_v7, %s2374_s20  ;;  %552 = vrot.lane.b32.xlu1 %v257_v5, %s2375_s21 }
  0x34   : > { %554 = vrot.lane.b32.xlu0 %v258_v7, %s2375_s21  ;;  %556 = vrot.lane.b32.xlu1 %v2494_v4, %s2375_s21  ;;  %s2880_s21 = scalar_lea.hbm %s2922_s6, %s2172_s17 }
  0x38   : > { %709 = vrot.lane.b32.xlu0 %v2494_v4, %s2376_s22  ;;  %705 = vrot.lane.b32.xlu1 %v257_v5, %s2376_s22 }
  0x3c   : > { %707 = vrot.lane.b32.xlu0 %v258_v7, %s2376_s22  ;;  %858 = vrot.lane.b32.xlu1 %v257_v5, %s2377_s23  ;;  %s2385_s22 = smov [#allocation4]  }
  0x40   : > { %860 = vrot.lane.b32.xlu0 %v258_v7, %s2377_s23  ;;  %862 = vrot.lane.b32.xlu1 %v2494_v4, %s2377_s23 }
  0x44   : > { %1015 = vrot.lane.b32.xlu0 %v2494_v4, %s2378_s24  ;;  %1011 = vrot.lane.b32.xlu1 %v257_v5, %s2378_s24 }
  0x48   : > { %1013 = vrot.lane.b32.xlu0 %v258_v7, %s2378_s24  ;;  %1164 = vrot.lane.b32.xlu1 %v257_v5, %s2379_s25  ;;  %s2312_s24 = sshll.u32 %s2385_s22, 4  ;;  %s2313_s24 = int_to_ptr.vmem [resolvable:$false] %s2312_s24 }
  0x49   : > { %p2315_p5 = scmp.lt.s32.totalorder %s1879_s15, %s2313_s24 }
  0x4c   : > { %1166 = vrot.lane.b32.xlu0 %v258_v7, %s2379_s25  ;;  %1168 = vrot.lane.b32.xlu1 %v2494_v4, %s2379_s25  ;;  %s2314_s25 = scalar_lea.vmem %s2313_s24, 384 }
  0x50   : > { %1321 = vrot.lane.b32.xlu0 %v2494_v4, %s2380_s30  ;;  %1317 = vrot.lane.b32.xlu1 %v257_v5, %s2380_s30 }
  0x54   : > { %1319 = vrot.lane.b32.xlu0 %v258_v7, %s2380_s30  ;;  %1470 = vrot.lane.b32.xlu1 %v257_v5, %s2381_s8  ;;  %v2239_v5 = vld [vmem:[%s2919_s3 + $0x58] sm:$0xff]  }
  0x58   : > { %1472 = vrot.lane.b32.xlu0 %v258_v7, %s2381_s8  ;;  %1474 = vrot.lane.b32.xlu1 %v2494_v4, %s2381_s8 }
  0x5c   : > { %1629 = vperm.xlu1 %2226, %v1611_v8   ;;  %1624 = vperm.xlu0 %2225, %v1610_v9  }
  0x60   : > { %1614 = vperm.xlu1 %2226, %v1608_v10   ;;  %1619 = vperm.xlu0 %2225, %v1609_v11  }
  0x64   : > { %1738 = vperm.xlu1 %2226, %v1735_v12   ;;  %v2241_v12 = vld [vmem:[%s2919_s3 + $0x68] sm:$0xff]  }
  0x9e   : > { %v287_v13 = vpop.permute.xlu1 %286  ;;  %v283_v14 = vpop.permute.xlu0 %282 }
  0x9f   : > { %2161 = vmatprep.subr.msk.bf16.mxu1 %vm298_vm1, %v287_v13  ;;  %v306_v15 = vsel %vm298_vm1, %v287_v13, 0 }
  0xa0   : > { %2100 = vmatpush3.bf16.msra.mxu1 %v306_v15 }
  0xa1   : > { %1969 = vmatprep.subr.msk.bf16.mxu1 %vm298_vm1, %v258_v7 }
  0xa2   : > { %v285_v18 = vpop.permute.xlu0 %284  ;;  %v553_v19 = vpop.permute.xlu1 %552 }
  0xa3   : > { %2102 = vmatmul.mubr.msk.bf16.vlgmr.msra.gmra.mxu1 %vm291_vm0, %v2229_v16  ;;  %v290_v20 = vsel %vm288_vm2, %v285_v18, %v287_v13  ;;  %v289_v21 = vsel %vm288_vm2, %v283_v14, %v285_v18 }
  0xa4   : > { %1962 = vmatprep.subr.msk.bf16.mxu0 %vm298_vm1, %v290_v20  ;;  %v300_v22 = vsel %vm298_vm1, %v289_v21, 0  ;;  %450 = vmatpush1.bf16.msra.mxu1 %v427_v17  ;;  %v2242_v17 = vld [vmem:[%s2919_s3 + $0x70] sm:$0xff]   ;;  %v2243_v20 = vld [vmem:[%s2919_s3 + $0x78] sm:$0xff]   ;;  %v2244_v21 = vld [vmem:[%s2919_s3 + $0x80] sm:$0xff]  }
  0xa5   : > { %323 = vmatpush1.bf16.msra.mxu0 %v300_v22  ;;  %467 = vmatprep.mubr.bf16.mxu1 %v2373_v1 }
  0xa6   : > { %2162 = vmatprep.subr.msk.bf16.mxu0 %vm298_vm1, %v2494_v4  ;;  %v555_v24 = vpop.permute.xlu0 %554  ;;  %v557_v25 = vpop.permute.xlu1 %556 }
  0xa7   : > { %v560_v27 = vsel %vm558_vm3, %v555_v24, %v557_v25  ;;  %2163 = vmatprep.subr.msk.bf16.mxu1 %vm298_vm1, %v557_v25  ;;  %v574_v28 = vsel %vm298_vm1, %v557_v25, 0  ;;  %v559_v35 = vsel %vm558_vm3, %v553_v19, %v555_v24  ;;  %v2245_v24 = vld [vmem:[%s2919_s3 + $0x88] sm:$0xff]  }
  0xa8   : > { %1963 = vmatmul.mubr.msk.bf16.vlgmr.msra.gmra.mxu0 %vm291_vm0, %v2476_v0  ;;  %v568_v38 = vsel %vm298_vm1, %v559_v35, 0 }
  0xa9   : > { %2106 = vmatpush3.bf16.msra.mxu0 %v433_v23  ;;  %350 = vmatprep.mubr.bf16.mxu0 %v2373_v1 }
  0xaa   : > { %1980 = vmatprep.subr.msk.bf16.mxu0 %vm298_vm1, %v560_v27  ;;  %v710_v29 = vpop.permute.xlu0 %709  ;;  %v706_v34 = vpop.permute.xlu1 %705 }
  0xab   : > { %1970 = vmatmul.mubr.msk.bf16.vlgmr.msra.gmra.mxu1 %vm291_vm0, %v2230_v26  ;;  %v727_v44 = vsel %vm298_vm1, %v710_v29, 0 }
  0xac   : > { %477 = vmatprep.mubr.bf16.mxu1 %v2373_v1  ;;  %2112 = vmatpush3.bf16.msra.mxu1 %v574_v28 }
  0xae   : > { %v708_v30 = vpop.permute.xlu0 %707  ;;  %v859_v37 = vpop.permute.xlu1 %858 }
  0xaf   : > { %v713_v32 = vsel %vm711_vm4, %v708_v30, %v710_v29  ;;  %v712_v39 = vsel %vm711_vm4, %v706_v34, %v708_v30 }
  0xb0   : > { %1964 = vmatmul.mubr.msk.bf16.gmra.mxu0 %vm291_vm0, %v2229_v16  ;;  %1991 = vmatprep.subr.msk.bf16.mxu1 %vm298_vm1, %v713_v32  ;;  %v721_v41 = vsel %vm298_vm1, %v712_v39, 0 }
  0xb1   : > { %2107 = vmatprep.mubr.msk.bf16.mxu0 %vm291_vm0, %v2230_v26 }
  0xb2   : > { %v861_v36 = vpop.permute.xlu0 %860  ;;  %v863_v43 = vpop.permute.xlu1 %862 }
  0xb3   : > { %1971 = vmatmul.mubr.msk.bf16.gmra.mxu1 %vm291_vm0, %v2231_v31  ;;  %v866_v46 = vsel %vm864_vm5, %v861_v36, %v863_v43  ;;  %v880_v48 = vsel %vm298_vm1, %v863_v43, 0  ;;  %v865_v53 = vsel %vm864_vm5, %v859_v37, %v861_v36 }
  0xb4   : > { %2113 = vmatprep.mubr.msk.bf16.mxu1 %vm291_vm0, %v2232_v33  ;;  %v874_v56 = vsel %vm298_vm1, %v865_v53, 0 }
  0xb6   : > { %v1016_v42 = vpop.permute.xlu0 %1015  ;;  %v1012_v52 = vpop.permute.xlu1 %1011 }
  0xb7   : > { %v1033_v62 = vsel %vm298_vm1, %v1016_v42, 0 }
  0xb8   : > { %2108 = vmatmul.mubr.msk.bf16.vlgmr.msra.gmra.mxu0 %vm291_vm0, %v2231_v31 }
  0xb9   : > { %591 = vmatpush1.bf16.msra.mxu0 %v568_v38  ;;  %608 = vmatprep.mubr.bf16.mxu0 %v2373_v1  ;;  %v2923_v38 = vmov 0.0  }
  0xba   : > { %2164 = vmatprep.subr.msk.bf16.mxu0 %vm298_vm1, %v710_v29  ;;  %v1014_v47 = vpop.permute.xlu0 %1013  ;;  %v1165_v55 = vpop.permute.xlu1 %1164 }
  0xbb   : > { %2114 = vmatmul.mubr.msk.bf16.vlgmr.msra.gmra.mxu1 %vm291_vm0, %v2233_v40  ;;  %v1019_v49 = vsel %vm1017_vm6, %v1014_v47, %v1016_v42  ;;  %v1018_v57 = vsel %vm1017_vm6, %v1012_v52, %v1014_v47 }
  0xbc   : > { %744 = vmatpush1.bf16.msra.mxu1 %v721_v41  ;;  %761 = vmatprep.mubr.bf16.mxu1 %v2373_v1  ;;  %v1027_v59 = vsel %vm298_vm1, %v1018_v57, 0 }
  0xbd   : > { %2165 = vmatprep.subr.msk.bf16.mxu1 %vm298_vm1, %v863_v43 }
  0xbe   : > { %v1167_v54 = vpop.permute.xlu0 %1166  ;;  %v1169_v61 = vpop.permute.xlu1 %1168 }
  0xbf   : > { %v1172_v0 = vsel %vm1170_vm7, %v1167_v54, %v1169_v61  ;;  %v1186_v3 = vsel %vm298_vm1, %v1169_v61, 0  ;;  %v1171_v8 = vsel %vm1170_vm7, %v1165_v55, %v1167_v54 }
  0xc0   : > { %1981 = vmatmul.mubr.msk.bf16.vlgmr.msra.gmra.mxu0 %vm291_vm0, %v2232_v33  ;;  %v1180_v10 = vsel %vm298_vm1, %v1171_v8, 0 }
  0xc1   : > { %2118 = vmatpush3.bf16.msra.mxu0 %v727_v44  ;;  %618 = vmatprep.mubr.bf16.mxu0 %v2373_v1 }
  0xc2   : > { %2002 = vmatprep.subr.msk.bf16.mxu0 %vm298_vm1, %v866_v46  ;;  %v1322_v60 = vpop.permute.xlu0 %1321  ;;  %v1318_v7 = vpop.permute.xlu1 %1317 }
  0xc3   : > { %1992 = vmatmul.mubr.msk.bf16.vlgmr.msra.gmra.mxu1 %vm291_vm0, %v2234_v45  ;;  %v1339_v16 = vsel %vm298_vm1, %v1322_v60, 0 }
  0xc4   : > { %771 = vmatprep.mubr.bf16.mxu1 %v2373_v1  ;;  %2124 = vmatpush3.bf16.msra.mxu1 %v880_v48 }
  0xc5   : > { %2013 = vmatprep.subr.msk.bf16.mxu1 %vm298_vm1, %v1019_v49 }
  0xc6   : > { %v1320_v2 = vpop.permute.xlu0 %1319  ;;  %v1471_v9 = vpop.permute.xlu1 %1470 }
  0xc7   : > { %v1325_v4 = vsel %vm1323_vm8, %v1320_v2, %v1322_v60  ;;  %v1324_v11 = vsel %vm1323_vm8, %v1318_v7, %v1320_v2 }
  0xc8   : > { %1982 = vmatmul.mubr.msk.bf16.gmra.mxu0 %vm291_vm0, %v2233_v40  ;;  %v1333_v13 = vsel %vm298_vm1, %v1324_v11, 0 }
  0xc9   : > { %2119 = vmatprep.mubr.msk.bf16.mxu0 %vm291_vm0, %v2234_v45 }
  0xca   : > { %v1475_v14 = vpop.permute.xlu1 %1474  ;;  %v1473_v15 = vpop.permute.xlu0 %1472 }
  0xcb   : > { %1993 = vmatmul.mubr.msk.bf16.gmra.mxu1 %vm291_vm0, %v2235_v50  ;;  %v1478_v18 = vsel %vm1476_vm9, %v1473_v15, %v1475_v14  ;;  %v1492_v19 = vsel %vm298_vm1, %v1475_v14, 0  ;;  %v1477_v22 = vsel %vm1476_vm9, %v1471_v9, %v1473_v15 }
  0xcc   : > { %2125 = vmatprep.mubr.msk.bf16.mxu1 %vm291_vm0, %v2236_v51  ;;  %v1486_v23 = vsel %vm298_vm1, %v1477_v22, 0 }
  0xd0   : > { %2120 = vmatmul.mubr.msk.bf16.vlgmr.msra.gmra.mxu0 %vm291_vm0, %v2235_v50 }
  0xd1   : > { %897 = vmatpush1.bf16.msra.mxu0 %v874_v56  ;;  %914 = vmatprep.mubr.bf16.mxu0 %v2373_v1 }
  0xd2   : > { %2166 = vmatprep.subr.msk.bf16.mxu0 %vm298_vm1, %v1016_v42 }
  0xd3   : > { %2126 = vmatmul.mubr.msk.bf16.vlgmr.msra.gmra.mxu1 %vm291_vm0, %v2237_v58 }
  0xd4   : > { %1050 = vmatpush1.bf16.msra.mxu1 %v1027_v59  ;;  %1067 = vmatprep.mubr.bf16.mxu1 %v2373_v1 }
  0xd5   : > { %2167 = vmatprep.subr.msk.bf16.mxu1 %vm298_vm1, %v1169_v61 }
  0xd8   : > { %2003 = vmatmul.mubr.msk.bf16.vlgmr.msra.gmra.mxu0 %vm291_vm0, %v2236_v51 }
  0xd9   : > { %2130 = vmatpush3.bf16.msra.mxu0 %v1033_v62  ;;  %924 = vmatprep.mubr.bf16.mxu0 %v2373_v1 }
  0xda   : > { %2024 = vmatprep.subr.msk.bf16.mxu0 %vm298_vm1, %v1172_v0 }
  0xdb   : > { %2014 = vmatmul.mubr.msk.bf16.vlgmr.msra.gmra.mxu1 %vm291_vm0, %v2238_v63 }
  0xdc   : > { %1077 = vmatprep.mubr.bf16.mxu1 %v2373_v1  ;;  %2136 = vmatpush3.bf16.msra.mxu1 %v1186_v3 }
  0xdd   : > { %2035 = vmatprep.subr.msk.bf16.mxu1 %vm298_vm1, %v1325_v4 }
  0xe0   : > { %2004 = vmatmul.mubr.msk.bf16.gmra.mxu0 %vm291_vm0, %v2237_v58 }
  0xe1   : > { %2131 = vmatprep.mubr.msk.bf16.mxu0 %vm291_vm0, %v2238_v63 }
  0xe3   : > { %2015 = vmatmul.mubr.msk.bf16.gmra.mxu1 %vm291_vm0, %v2239_v5 }
  0xe4   : > { %2137 = vmatprep.mubr.msk.bf16.mxu1 %vm291_vm0, %v2240_v6 }
  0xe8   : > { %2132 = vmatmul.mubr.msk.bf16.vlgmr.msra.gmra.mxu0 %vm291_vm0, %v2239_v5 }
  0xe9   : > { %1203 = vmatpush1.bf16.msra.mxu0 %v1180_v10  ;;  %1220 = vmatprep.mubr.bf16.mxu0 %v2373_v1 }
  0xea   : > { %2168 = vmatprep.subr.msk.bf16.mxu0 %vm298_vm1, %v1322_v60 }
  0xeb   : > { %2138 = vmatmul.mubr.msk.bf16.vlgmr.msra.gmra.mxu1 %vm291_vm0, %v2241_v12 }
  0xec   : > { %1356 = vmatpush1.bf16.msra.mxu1 %v1333_v13  ;;  %1373 = vmatprep.mubr.bf16.mxu1 %v2373_v1 }
  0xed   : > { %2169 = vmatprep.subr.msk.bf16.mxu1 %vm298_vm1, %v1475_v14 }
  0xf0   : > { %2025 = vmatmul.mubr.msk.bf16.vlgmr.msra.gmra.mxu0 %vm291_vm0, %v2240_v6 }
  0xf1   : > { %2142 = vmatpush3.bf16.msra.mxu0 %v1339_v16  ;;  %1230 = vmatprep.mubr.bf16.mxu0 %v2373_v1 }
  0xf2   : > { %2046 = vmatprep.subr.msk.bf16.mxu0 %vm298_vm1, %v1478_v18 }
  0xf3   : > { %2036 = vmatmul.mubr.msk.bf16.vlgmr.msra.gmra.mxu1 %vm291_vm0, %v2242_v17 }
  0xf4   : > { %1383 = vmatprep.mubr.bf16.mxu1 %v2373_v1  ;;  %2148 = vmatpush3.bf16.msra.mxu1 %v1492_v19 }
  0xf8   : > { %2026 = vmatmul.mubr.msk.bf16.gmra.mxu0 %vm291_vm0, %v2241_v12 }
  0xf9   : > { %2143 = vmatprep.mubr.msk.bf16.mxu0 %vm291_vm0, %v2242_v17 }
  0xfb   : > { %2037 = vmatmul.mubr.msk.bf16.gmra.mxu1 %vm291_vm0, %v2243_v20 }
  0xfc   : > { %2149 = vmatprep.mubr.msk.bf16.mxu1 %vm291_vm0, %v2244_v21 }
 0x100   : > { %2144 = vmatmul.mubr.msk.bf16.vlgmr.msra.gmra.mxu0 %vm291_vm0, %v2243_v20 }
 0x101   : > { %1509 = vmatpush1.bf16.msra.mxu0 %v1486_v23  ;;  %1526 = vmatprep.mubr.bf16.mxu0 %v2373_v1 }
 0x102   : > { %2153 = vmatprep.subr.bf16.mxu0 %v2923_v38 }
 0x103   : > { %2150 = vmatmul.mubr.msk.bf16.vlgmr.msra.gmra.mxu1 %vm291_vm0, %v2245_v24 }
 0x104   : > { %1777 = vmatprep.mubr.bf16.mxu1 %v2373_v1 }
 0x108   : > { %2047 = vmatmul.mubr.msk.bf16.vlgmr.msra.gmra.mxu0 %vm291_vm0, %v2244_v21 }
 0x109   : > { %1536 = vmatprep.mubr.bf16.mxu0 %v2373_v1 }
 0x110   : > { %2048 = vmatmul.mubr.msk.bf16.gmra.mxu0 %vm291_vm0, %v2245_v24 }
 0x111   : > { %2157 = vmatprep.mubr.msk.bf16.mxu0 %vm2383_vm10, %v2923_v38 }
 0x163   : > { %v2103_v25 = vpop.f32.mrf.mxu1 }
 0x165   : > { %v395_v26 = vpop.f32.mrf.mxu1 }
 0x167   : > { %v2669_v27 = vpop.f32.mrf.mxu1 }
 0x168   : > { %v342_v28 = vpop.f32.mrf.mxu0 }
 0x169   : > { %v2671_v29 = vpop.f32.mrf.mxu1 }
 0x16a   : > { %v344_v30 = vpop.f32.mrf.mxu0 }
 0x16b   : > { %v469_v31 = vpop.f32.mrf.mxu1 }
 0x16c   : > { %v470_v32 = vadd.f32 %v469_v31, %v342_v28  ;;  %v346_v33 = vpop.f32.mrf.mxu0 }
 0x16d   : > { %v471_v34 = vpop.f32.mrf.mxu1 }
 0x16e   : > { %v472_v35 = vadd.f32 %v471_v34, %v344_v30  ;;  %v348_v36 = vpop.f32.mrf.mxu0 }
 0x16f   : > { %v473_v37 = vpop.f32.mrf.mxu1 }
 0x170   : > { %v474_v1 = vadd.f32 %v473_v37, %v346_v33  ;;  %v352_v39 = vpop.f32.mrf.mxu0 }
 0x171   : > { %v475_v40 = vpop.f32.mrf.mxu1 }
 0x172   : > { %v476_v41 = vadd.f32 %v475_v40, %v348_v36  ;;  %v354_v42 = vpop.f32.mrf.mxu0 }
 0x173   : > { %v479_v43 = vpop.f32.mrf.mxu1 }
 0x174   : > { %v480_v44 = vadd.f32 %v479_v43, %v352_v39  ;;  %v356_v45 = vpop.f32.mrf.mxu0 }
 0x175   : > { %v481_v46 = vpop.f32.mrf.mxu1 }
 0x176   : > { %v482_v47 = vadd.f32 %v481_v46, %v354_v42  ;;  %v358_v48 = vpop.f32.mrf.mxu0 }
 0x177   : > { %v483_v49 = vpop.f32.mrf.mxu1 }
 0x178   : > { %v2675_v50 = vadd.f32 %v483_v49, %v356_v45  ;;  %v2109_v51 = vpop.f32.mrf.mxu0 }
 0x179   : > { %v531_v52 = vadd.f32 %v2109_v51, %v2103_v25  ;;  %v485_v53 = vpop.f32.mrf.mxu1 }
 0x17a   : > { %v2677_v54 = vadd.f32 %v485_v53, %v358_v48  ;;  %v522_v55 = vpop.f32.mrf.mxu0 }
 0x17b   : > { %v523_v56 = vadd.f32 %v522_v55, %v395_v26  ;;  %v2115_v57 = vpop.f32.mrf.mxu1 }
 0x17c   : > { %v2679_v58 = vadd.f32 %v2115_v57, %v531_v52  ;;  %v2681_v59 = vpop.f32.mrf.mxu0 }
 0x17d   : > { %v663_v60 = vpop.f32.mrf.mxu1 }
 0x17e   : > { %v2683_v61 = vadd.f32 %v663_v60, %v523_v56  ;;  %v2685_v62 = vpop.f32.mrf.mxu0 }
 0x17f   : > { %v2687_v63 = vpop.f32.mrf.mxu1 }
 0x180   : > { %v610_v0 = vpop.f32.mrf.mxu0 }
 0x181   : > { %v678_v2 = vadd.f32 %v610_v0, %v470_v32  ;;  %v2689_v3 = vpop.f32.mrf.mxu1 }
 0x182   : > { %v612_v4 = vpop.f32.mrf.mxu0 }
 0x183   : > { %v679_v5 = vadd.f32 %v612_v4, %v472_v35  ;;  %v763_v6 = vpop.f32.mrf.mxu1 }
 0x184   : > { %v2691_v7 = vadd.f32 %v763_v6, %v678_v2  ;;  %v614_v8 = vpop.f32.mrf.mxu0 }
 0x185   : > { %v681_v9 = vadd.f32 %v614_v8, %v474_v1  ;;  %v765_v10 = vpop.f32.mrf.mxu1 }
 0x186   : > { %v2693_v11 = vadd.f32 %v765_v10, %v679_v5  ;;  %v616_v12 = vpop.f32.mrf.mxu0 }
 0x187   : > { %v682_v13 = vadd.f32 %v616_v12, %v476_v41  ;;  %v767_v14 = vpop.f32.mrf.mxu1  ;;  %v534_v12 = vadd.f32 %v2681_v59, %v2669_v27 }
 0x188   : > { %v2695_v15 = vadd.f32 %v767_v14, %v681_v9  ;;  %v620_v16 = vpop.f32.mrf.mxu0 }
 0x189   : > { %v684_v17 = vadd.f32 %v620_v16, %v480_v44  ;;  %v769_v18 = vpop.f32.mrf.mxu1  ;;  %v526_v16 = vadd.f32 %v2685_v62, %v2671_v29 }
 0x18a   : > { %v2697_v19 = vadd.f32 %v769_v18, %v682_v13  ;;  %v622_v20 = vpop.f32.mrf.mxu0 }
 0x18b   : > { %v2699_v21 = vadd.f32 %v622_v20, %v482_v47  ;;  %v773_v22 = vpop.f32.mrf.mxu1  ;;  %v683_v59 = vadd.f32 %v2689_v3, %v526_v16  ;;  %v2785_v16 = vpop.permute.xlu0 %1624 }
 0x18c   : > { %v2701_v23 = vadd.f32 %v773_v22, %v684_v17  ;;  %v2703_v24 = vpop.f32.mrf.mxu0  ;;  %v689_v22 = vadd.f32 %v2687_v63, %v534_v12 }
 0x18d   : > { %v2705_v25 = vpop.f32.mrf.mxu1  ;;  %v687_v3 = vadd.f32 %v2703_v24, %v2675_v50 }
 0x18e   : > { %v2707_v26 = vpop.f32.mrf.mxu0 }
 0x18f   : > { %v2709_v28 = vpop.f32.mrf.mxu1 }
 0x190   : > { %v2121_v30 = vpop.f32.mrf.mxu0 }
 0x191   : > { %v2711_v31 = vpop.f32.mrf.mxu1  ;;  %v839_v17 = vadd.f32 %v2121_v30, %v2679_v58 }
 0x192   : > { %v816_v32 = vpop.f32.mrf.mxu0 }
 0x193   : > { %v2127_v33 = vpop.f32.mrf.mxu1  ;;  %v833_v38 = vadd.f32 %v816_v32, %v2683_v61 }
 0x194   : > { %v2122_v34 = vpop.f32.mrf.mxu0 }
 0x195   : > { %v969_v35 = vpop.f32.mrf.mxu1 }
 0x196   : > { %v819_v36 = vpop.f32.mrf.mxu0  ;;  %v986_v58 = vadd.f32 %v969_v35, %v833_v38 }
 0x197   : > { %v2128_v37 = vpop.f32.mrf.mxu1  ;;  %v836_v62 = vadd.f32 %v819_v36, %v683_v59 }
 0x198   : > { %v916_v1 = vpop.f32.mrf.mxu0 }
 0x199   : > { %v972_v39 = vpop.f32.mrf.mxu1  ;;  %v984_v63 = vadd.f32 %v916_v1, %v2691_v7  ;;  %v838_v7 = vadd.f32 %v2705_v25, %v2699_v21 }
 0x19a   : > { %v918_v40 = vpop.f32.mrf.mxu0 }
 0x19b   : > { %v1069_v41 = vpop.f32.mrf.mxu1  ;;  %v985_v38 = vadd.f32 %v918_v40, %v2693_v11 }
 0x19c   : > { %v920_v42 = vpop.f32.mrf.mxu0  ;;  %v1137_v1 = vadd.f32 %v1069_v41, %v984_v63 }
 0x19d   : > { %v2713_v43 = vpop.f32.mrf.mxu1  ;;  %v987_v50 = vadd.f32 %v920_v42, %v2695_v15 }
 0x19e   : > { %v922_v44 = vpop.f32.mrf.mxu0 }
 0x19f   : > { %v2715_v45 = vpop.f32.mrf.mxu1 }
 0x1a0   : > { %v2717_v46 = vpop.f32.mrf.mxu0 }
 0x1a1   : > { %v2719_v47 = vpop.f32.mrf.mxu1 }
 0x1a2   : > { %v928_v48 = vpop.f32.mrf.mxu0 }
 0x1a3   : > { %v2721_v49 = vpop.f32.mrf.mxu1  ;;  %v991_v21 = vadd.f32 %v928_v48, %v838_v7 }
 0x1a4   : > { %v2723_v51 = vpop.f32.mrf.mxu0 }
 0x1a5   : > { %v2725_v52 = vpop.f32.mrf.mxu1 }
 0x1a6   : > { %v2727_v53 = vpop.f32.mrf.mxu0 }
 0x1a7   : > { %v2729_v55 = vpop.f32.mrf.mxu1 }
 0x1a8   : > { %2926 = vst [vmem:[#allocation8_spill] sm:$0xff] %v2729_v55  ;;  %v2133_v56 = vpop.f32.mrf.mxu0  ;;  %v992_v55 = vadd.f32 %v2127_v33, %v839_v17 }
 0x1a9   : > { %v2731_v57 = vpop.f32.mrf.mxu1 }
 0x1aa   : > { %2927 = vst [vmem:[#allocation9_spill] sm:$0xff] %v2731_v57  ;;  %v1122_v60 = vpop.f32.mrf.mxu0  ;;  %v1145_v30 = vadd.f32 %v2133_v56, %v992_v55  ;;  %v2771_v56 = vpop.permute.xlu1 %1629 }
 0x1ab   : > { %v2139_v0 = vpop.f32.mrf.mxu1  ;;  %v1139_v12 = vadd.f32 %v1122_v60, %v986_v58 }
 0x1ac   : > { %v2134_v2 = vpop.f32.mrf.mxu0  ;;  %v1298_v35 = vadd.f32 %v2139_v0, %v1145_v30 }
 0x1ad   : > { %v1275_v4 = vpop.f32.mrf.mxu1 }
 0x1ae   : > { %v1125_v5 = vpop.f32.mrf.mxu0  ;;  %v1292_v60 = vadd.f32 %v1275_v4, %v1139_v12 }
 0x1af   : > { %v2140_v6 = vpop.f32.mrf.mxu1  ;;  %v2934_v63 = vld [vmem:[#allocation8_spill] sm:$0xff] }
 0x1b0   : > { %v1222_v8 = vpop.f32.mrf.mxu0 }
 0x1b1   : > { %v1278_v9 = vpop.f32.mrf.mxu1  ;;  %v1290_v41 = vadd.f32 %v1222_v8, %v1137_v1 }
 0x1b2   : > { %v1224_v10 = vpop.f32.mrf.mxu0 }
 0x1b3   : > { %v2735_v13 = vpop.f32.mrf.mxu1 }
 0x1b4   : > { %2928 = vst [vmem:[#allocation10_spill] sm:$0xff] %v2735_v13  ;;  %v2737_v14 = vpop.f32.mrf.mxu0 }
 0x1b5   : > { %2929 = vst [vmem:[#allocation11_spill] sm:$0xff] %v2737_v14  ;;  %v2742_v18 = vpop.f32.mrf.mxu1  ;;  %v842_v14 = vadd.f32 %v2122_v34, %v689_v22  ;;  %v989_v34 = vadd.f32 %v972_v39, %v836_v62  ;;  %v988_v39 = vadd.f32 %v922_v44, %v2697_v19  ;;  %v1140_v44 = vadd.f32 %v2715_v45, %v987_v50 }
 0x1b6   : > { %v2744_v20 = vpop.f32.mrf.mxu0  ;;  %v1144_v22 = vadd.f32 %v2725_v52, %v991_v21 }
 0x1b7   : > { %2930 = vst [vmem:[#allocation12_spill] sm:$0xff] %v2744_v20  ;;  %v2748_v57 = vpop.f32.mrf.mxu1  ;;  %v995_v32 = vadd.f32 %v2128_v37, %v842_v14  ;;  %v688_v37 = vadd.f32 %v2707_v26, %v2677_v54  ;;  %v1142_v11 = vadd.f32 %v1125_v5, %v989_v34  ;;  %v990_v14 = vadd.f32 %v2717_v46, %v2701_v23 }
 0x1b8   : > { %2931 = vst [vmem:[#allocation13_spill] sm:$0xff] %v2748_v57  ;;  %v2750_v27 = vpop.f32.mrf.mxu0  ;;  %v1138_v54 = vadd.f32 %v2713_v43, %v985_v38  ;;  %v1141_v23 = vadd.f32 %v2719_v47, %v988_v39 }
 0x1b9   : > { %v2753_v13 = vpop.f32.mrf.mxu1  ;;  %v1148_v36 = vadd.f32 %v2134_v2, %v995_v32  ;;  %v840_v2 = vadd.f32 %v2709_v28, %v687_v3  ;;  %v841_v19 = vadd.f32 %v2711_v31, %v688_v37  ;;  %v1295_v46 = vadd.f32 %v1278_v9, %v1142_v11  ;;  %v1620_v37 = vpop.permute.xlu0 %1619 }
 0x1ba   : > { %v2755_v29 = vpop.f32.mrf.mxu0  ;;  %v1291_v48 = vadd.f32 %v1224_v10, %v1138_v54  ;;  %v1143_v8 = vadd.f32 %v2721_v49, %v990_v14 }
 0x1bb   : > { %v2757_v20 = vpop.f32.mrf.mxu1  ;;  %v1301_v26 = vadd.f32 %v2140_v6, %v1148_v36  ;;  %v993_v4 = vadd.f32 %v2723_v51, %v840_v2  ;;  %v1615_v6 = vpop.permute.xlu1 %1614  ;;  %v994_v51 = vadd.f32 %v2727_v53, %v841_v19  ;;  %v2932_v58 = vld [vmem:[#allocation10_spill] sm:$0xff] }
 0x1bc   : > { %v2760_v61 = vpop.f32.mrf.mxu0  ;;  %v1443_v62 = vadd.f32 %v2932_v58, %v1290_v41  ;;  %v2933_v30 = vld [vmem:[#allocation11_spill] sm:$0xff]  ;;  %v1444_v34 = vadd.f32 %v2742_v18, %v1291_v48  ;;  %v1296_v53 = vadd.f32 %v2750_v27, %v1143_v8  ;;  %v1297_v27 = vadd.f32 %v2755_v29, %v1144_v22 }
 0x1bd   : > { %v2762_v57 = vpop.f32.mrf.mxu1  ;;  %v1293_v47 = vadd.f32 %v2933_v30, %v1140_v44  ;;  %v1146_v32 = vadd.f32 %v2934_v63, %v993_v4 }
 0x1be   : > { %v2766_v33 = vpop.f32.mrf.mxu0  ;;  %v2935_v38 = vld [vmem:[#allocation12_spill] sm:$0xff]  ;;  %v1449_v19 = vadd.f32 %v2757_v20, %v1296_v53 }
 0x1bf   : > { %v2769_v55 = vpop.f32.mrf.mxu1  ;;  %v1299_v44 = vadd.f32 %v2760_v61, %v1146_v32 }
 0x1c0   : > { %v2145_v24 = vpop.f32.mrf.mxu0 }
 0x1c1   : > { %v1451_v40 = vadd.f32 %v2145_v24, %v1298_v35  ;;  %v2779_v0 = vpop.f32.mrf.mxu1  ;;  %v1294_v35 = vadd.f32 %v2935_v38, %v1141_v23 }
 0x1c2   : > { %v1428_v25 = vpop.f32.mrf.mxu0 }
 0x1c3   : > { %v1445_v15 = vadd.f32 %v1428_v25, %v1292_v60  ;;  %v2151_v42 = vpop.f32.mrf.mxu1  ;;  %v2936_v60 = vld [vmem:[#allocation9_spill] sm:$0xff] }
 0x1c4   : > { %v1604_v28 = vadd.f32 %v2151_v42, %v1451_v40  ;;  %v2146_v5 = vpop.f32.mrf.mxu0  ;;  %v1147_v11 = vadd.f32 %v2936_v60, %v994_v51  ;;  %v2937_v40 = vld [vmem:[#allocation13_spill] sm:$0xff] }
 0x1c5   : > { %v1454_v17 = vadd.f32 %v2146_v5, %v1301_v26  ;;  %v1581_v43 = vpop.f32.mrf.mxu1  ;;  %v1446_v2 = vadd.f32 %v2937_v40, %v1293_v47  ;;  %v1447_v26 = vadd.f32 %v2753_v13, %v1294_v35  ;;  %v1450_v13 = vadd.f32 %v2762_v57, %v1297_v27 }
 0x1c6   : > { %v2794_v59 = vadd.f32 %v2785_v16, %v1604_v28  ;;  %v1598_v31 = vadd.f32 %v1581_v43, %v1445_v15  ;;  %v1431_v45 = vpop.f32.mrf.mxu0  ;;  %v1452_v43 = vadd.f32 %v2769_v55, %v1299_v44 }
 0x1c7   : > { %v1448_v9 = vadd.f32 %v1431_v45, %v1295_v46  ;;  %v2152_v10 = vpop.f32.mrf.mxu1  ;;  %v1300_v46 = vadd.f32 %v2766_v33, %v1147_v11 }
 0x1c8   : > { %v2059_v12 = vmul.f32 -1.442695, %v2794_v59  ;;  %v2801_v49 = vadd.f32 %v1615_v6, %v1598_v31  ;;  %v1607_v52 = vadd.f32 %v2152_v10, %v1454_v17  ;;  %v1528_v3 = vpop.f32.mrf.mxu0 }
 0x1c9   : > { %v1596_v36 = vadd.f32 %v1528_v3, %v1443_v62  ;;  %v1584_v7 = vpop.f32.mrf.mxu1  ;;  %v1453_v33 = vadd.f32 %v2779_v0, %v1300_v46 }
 0x1ca   : > { %2246 = vpow2.f32 %v2059_v12  ;;  %v2053_v1 = vmul.f32 -1.442695, %v2801_v49  ;;  %v2808_v50 = vadd.f32 %v2771_v56, %v1607_v52  ;;  %v1601_v24 = vadd.f32 %v1584_v7, %v1448_v9  ;;  %v1530_v39 = vpop.f32.mrf.mxu0 }
 0x1cb   : > { %v2812_v18 = vadd.f32 %v1615_v6, %v1596_v36  ;;  %v1597_v14 = vadd.f32 %v1530_v39, %v1444_v34 }
 0x1cc   : > { %2248 = vpow2.f32 %v2053_v1  ;;  %v2062_v21 = vmul.f32 -1.442695, %v2808_v50  ;;  %v2816_v25 = vadd.f32 %v1620_v37, %v1601_v24  ;;  %v1532_v54 = vpop.f32.mrf.mxu0 }
 0x1cd   : > { %v2051_v41 = vmul.f32 -1.442695, %v2812_v18  ;;  %v2820_v15 = vadd.f32 %v1615_v6, %v1597_v14  ;;  %v1599_v42 = vadd.f32 %v1532_v54, %v1446_v2 }
 0x1ce   : > { %2250 = vpow2.f32 %v2062_v21  ;;  %v2056_v29 = vmul.f32 -1.442695, %v2816_v25  ;;  %v1534_v4 = vpop.f32.mrf.mxu0 }
 0x1cf   : > { %2252 = vpow2.f32 %v2051_v41  ;;  %v2052_v28 = vmul.f32 -1.442695, %v2820_v15  ;;  %v2826_v5 = vadd.f32 %v1620_v37, %v1599_v42  ;;  %v1600_v23 = vadd.f32 %v1534_v4, %v1447_v26 }
 0x1d0   : > { %2254 = vpow2.f32 %v2056_v29  ;;  %v1538_v48 = vpop.f32.mrf.mxu0 }
 0x1d1   : > { %2256 = vpow2.f32 %v2052_v28  ;;  %v2054_v20 = vmul.f32 -1.442695, %v2826_v5  ;;  %v2831_v61 = vadd.f32 %v1620_v37, %v1600_v23  ;;  %v1602_v17 = vadd.f32 %v1538_v48, %v1449_v19 }
 0x1d2   : > { %v1540_v6 = vpop.f32.mrf.mxu0 }
 0x1d3   : > { %2258 = vpow2.f32 %v2054_v20  ;;  %v2055_v8 = vmul.f32 -1.442695, %v2831_v61  ;;  %v2836_v22 = vadd.f32 %v2785_v16, %v1602_v17  ;;  %v1603_v57 = vadd.f32 %v1540_v6, %v1450_v13 }
 0x1d4   : > { %v1542_v31 = vpop.f32.mrf.mxu0 }
 0x1d5   : > { %2260 = vpow2.f32 %v2055_v8  ;;  %v2057_v45 = vmul.f32 -1.442695, %v2836_v22  ;;  %v2841_v51 = vadd.f32 %v2785_v16, %v1603_v57  ;;  %v1605_v58 = vadd.f32 %v1542_v31, %v1452_v43 }
 0x1d6   : > { %v1544_v62 = vpop.f32.mrf.mxu0  ;;  %v2938_v43 = vmov 0.0  }
 0x1d7   : > { %v2247_v55 = vpop.eup %2246  ;;  %2262 = vpow2.f32 %v2057_v45  ;;  %v2058_v30 = vmul.f32 -1.442695, %v2841_v51  ;;  %v2845_v47 = vadd.f32 %v2771_v56, %v1605_v58  ;;  %v1606_v9 = vadd.f32 %v1544_v62, %v1453_v33 }
 0x1d8   : > { %v1688_v10 = vadd.f32 1.0, %v2247_v55  ;;  %v1739_v55 = vpop.permute.xlu1 %1738 }
 0x1d9   : > { %v2249_v63 = vpop.eup %2248  ;;  %2264 = vpow2.f32 %v2058_v30  ;;  %v2060_v0 = vmul.f32 -1.442695, %v2845_v47  ;;  %v2849_v32 = vadd.f32 %v2771_v56, %v1606_v9  ;;  %v1826_v9 = vstv %s251_s9 }
 0x1da   : > { %2266 = vrcp.f32 %v1688_v10  ;;  %v1682_v16 = vadd.f32 1.0, %v2249_v63 }
 0x1db   : > { %v2251_v12 = vpop.eup %2250  ;;  %2268 = vpow2.f32 %v2060_v0  ;;  %v2061_v52 = vmul.f32 -1.442695, %v2849_v32 }
 0x1dc   : > { %v2253_v3 = vpop.eup %2252  ;;  %2270 = vrcp.f32 %v1682_v16  ;;  %v1691_v34 = vadd.f32 1.0, %v2251_v12 }
 0x1dd   : > { %v2255_v38 = vpop.eup %2254  ;;  %v1680_v35 = vadd.f32 1.0, %v2253_v3  ;;  %2272 = vpow2.f32 %v2061_v52 }
 0x1de   : > { %v2257_v53 = vpop.eup %2256  ;;  %2274 = vrcp.f32 %v1691_v34  ;;  %v1685_v36 = vadd.f32 1.0, %v2255_v38 }
 0x1df   : > { %v1681_v7 = vadd.f32 1.0, %v2257_v53 }
 0x1e0   : > { %v2259_v37 = vpop.eup %2258  ;;  %2276 = vrcp.f32 %v1685_v36 }
 0x1e1   : > { %2278 = vrcp.f32 %v1680_v35  ;;  %v1683_v56 = vadd.f32 1.0, %v2259_v37 }
 0x1e2   : > { %v2261_v1 = vpop.eup %2260  ;;  %2280 = vrcp.f32 %v1681_v7 }
 0x1e3   : > { %2282 = vrcp.f32 %v1683_v56  ;;  %v1684_v24 = vadd.f32 1.0, %v2261_v1  ;;  %v2294_v1 = vld [vmem:[%s2490_s19] sm:$0xff] }
 0x1e4   : > { %v2263_v39 = vpop.eup %2262 }
 0x1e5   : > { %2284 = vrcp.f32 %v1684_v24  ;;  %v1686_v60 = vadd.f32 1.0, %v2263_v39  ;;  %v2295_v39 = vld [vmem:[%s2490_s19 + $0x8] sm:$0xf] }
 0x1e6   : > { %v2265_v11 = vpop.eup %2264 }
 0x1e7   : > { %v2267_v40 = vpop.eup %2266  ;;  %v1687_v2 = vadd.f32 1.0, %v2265_v11  ;;  %2286 = vrcp.f32 %v1686_v60 }
 0x1e8   : > { %v2269_v14 = vpop.eup %2268  ;;  %v1724_v42 = vmul.f32 %v2267_v40, %v2794_v59 }
 0x1e9   : > { %v2271_v27 = vpop.eup %2270  ;;  %v1689_v21 = vadd.f32 1.0, %v2269_v14  ;;  %2288 = vrcp.f32 %v1687_v2 }
 0x1ea   : > { %v2273_v54 = vpop.eup %2272  ;;  %v1718_v4 = vmul.f32 %v2271_v27, %v2801_v49  ;;  %v1728_v49 = vld [vmem:[%s2920_s4] sm:$0x3] }
 0x1eb   : > { %v2275_v26 = vpop.eup %2274  ;;  %2290 = vrcp.f32 %v1689_v21  ;;  %v1690_v41 = vadd.f32 1.0, %v2273_v54 }
 0x1ec   : > { %v1727_v19 = vmul.f32 %v2275_v26, %v2808_v50 }
 0x1ed   : > { %v2277_v44 = vpop.eup %2276  ;;  %2292 = vrcp.f32 %v1690_v41 }
 0x1ee   : > { %v2279_v29 = vpop.eup %2278  ;;  %v1734_v28 = vpack.c.bf16 %v1727_v19, %v1724_v42  ;;  %v1721_v23 = vmul.f32 %v2277_v44, %v2816_v25 }
 0x1ef   : > { %v2281_v13 = vpop.eup %2280  ;;  %v1716_v20 = vmul.f32 %v2279_v29, %v2812_v18 }
 0x1f0   : > { %v2283_v46 = vpop.eup %2282  ;;  %2154 = vmatpush3.bf16.msra.mxu0 %v1734_v28  ;;  %v1731_v48 = vpack.c.bf16 %v1721_v23, %v1718_v4  ;;  %v1717_v50 = vmul.f32 %v2281_v13, %v2820_v15 }
 0x1f1   : > { %v1719_v17 = vmul.f32 %v2283_v46, %v2826_v5  ;;  %2155 = vmatprep.subr.bf16.mxu0 %v2938_v43 }
 0x1f2   : > { %v2285_v59 = vpop.eup %2284 }
 0x1f3   : > { %v1729_v6 = vpack.c.bf16 %v1719_v17, %v1716_v20  ;;  %v1720_v8 = vmul.f32 %v2285_v59, %v2831_v61 }
 0x1f4   : > { %2156 = vmatpush3.bf16.msra.mxu0 %v1731_v48  ;;  %v2287_v57 = vpop.eup %2286 }
 0x1f5   : > { %v1730_v25 = vpack.c.bf16 %v1720_v8, %v1717_v50  ;;  %v1722_v33 = vmul.f32 %v2287_v57, %v2836_v22 }
 0x1f6   : > { %v2289_v18 = vpop.eup %2288 }
 0x1f7   : > { %2158 = vmatmul.mubr.msk.bf16.vlgmr.msra.gmra.mxu0 %vm1741_vm11, %v1728_v49  ;;  %v1723_v61 = vmul.f32 %v2289_v18, %v2841_v51 }
 0x1f8   : > { %v2291_v5 = vpop.eup %2290 }
 0x1f9   : > { %v1725_v15 = vmul.f32 %v2291_v5, %v2845_v47 }
 0x1fa   : > { %v2293_v31 = vpop.eup %2292 }
 0x1fb   : > { %v1732_v45 = vpack.c.bf16 %v1725_v15, %v1722_v33  ;;  %v1726_v58 = vmul.f32 %v2293_v31, %v2849_v32 }
 0x1fd   : > { %v1733_v62 = vpack.c.bf16 %v1726_v58, %v1723_v61 }
 0x1ff   : > { %1757 = vmatprep.subr.bf16.mxu1 %v1733_v62 }
 0x200   : > { %1758 = vmatpush1.bf16.msra.mxu1 %v1732_v45 }
 0x201   : > { %1759 = vmatprep.subr.bf16.mxu1 %v1730_v25 }
 0x204   : > { %1760 = vmatpush1.bf16.msra.mxu1 %v1729_v6 }
 0x207   : > { %2063 = vmatmul.mubr.msk.bf16.vlgmr.msra.gmra.mxu1 %vm1741_vm11, %v1728_v49 }
 0x2b7   : > { %v1820_v30 = vpop.f32.mrf.mxu0 }
 0x2b8   : > { %v1821_v22 = vadd.f32 %v1820_v30, %v1739_v55 }
 0x2b9   : > { %v2159_v10 = vpop.f32.mrf.mxu0 }
 0x2ba   : > { %v1829_v47 = vmul.f32 %v1826_v9, %v1821_v22 }
 0x2bb   : > { %v1823_v63 = vpop.f32.mrf.mxu0 }
 0x2bc   : > { %1836 = vrot.lane.b32.xlu1 %v1829_v47, %s2384_s13 }
 0x2bd   : > { %v2160_v51 = vpop.f32.mrf.mxu0 }
 0x2c7   : > { %v1779_v0 = vpop.f32.mrf.mxu1 }
 0x2c8   : > { %v1780_v32 = vadd.f32 %v1779_v0, %v1739_v55 }
 0x2c9   : > { %v1781_v16 = vpop.f32.mrf.mxu1 }
 0x2ca   : > { %v1782_v12 = vadd.f32 %v1781_v16, %v1739_v55  ;;  %v1827_v3 = vmul.f32 %v1826_v9, %v1780_v32 }
 0x2cb   : > { %v1783_v52 = vpop.f32.mrf.mxu1 }
 0x2cc   : > { %v1828_v34 = vmul.f32 %v1826_v9, %v1782_v12 }
 0x2cd   : > { %v1784_v38 = vpop.f32.mrf.mxu1 }
 0x2ce   : > { %v1833_v35 = vcombine.low %v1827_v3, %v1828_v34 }
 0x2d0   : > { %1834 = vrot.lane.b32.xlu0 %v1833_v35, %s2384_s13 }
 0x32e   : > { %v1837_v7 = vpop.permute.xlu1 %1836 }
 0x342   : > { %v1835_v53 = vpop.permute.xlu0 %1834 }
 0x343   : > { %v1838_v36 = vrot.slane %v1835_v53, 4 }
 0x345   : > { %v1840_v37 = vsel %vm1839_vm12, %v1838_v36, %v1835_v53  ;;  %v1841_v56 = vsel %vm1839_vm12, %v1838_v36, %v1837_v7 }
 0x346   : > { %v1844_v24 = vadd.f32 %v2294_v1, %v1840_v37  ;;  %v1845_v60 = vadd.f32 %v2295_v39, %v1841_v56 }
 0x348   : > { %1850 = vrot.lane.b32.xlu1 %v1845_v60, %s2377_s23  ;;  %1848 = vrot.lane.b32.xlu0 %v1844_v24, %s2377_s23  ;;  %s2308_s23 = scalar_lea.vmem %s1879_s15, 192 }
 0x349   : > { %p2309_p2 = scmp.ne.s32.totalorder %s1879_s15, %s2308_s23  ;;  %p2316_p6 = scmp.lt.s32.totalorder %s2314_s25, %s2308_s23 }
 0x34b   : > { %p2310_p3 = pnand %p2309_p2, %p2462_p10  ;;  %p2317_p7 = por %p2316_p6, %p2315_p5 }
 0x34d   : > { %p2311_p4 = pneg %p2310_p3 }
 0x34f   : > { %p2318_p8 = pnand %p2317_p7, %p2311_p4 }
 0x3ba   : > { %v1851_v11 = vpop.permute.xlu1 %1850  ;;  %v1849_v40 = vpop.permute.xlu0 %1848 }
 0x3bb   : > { %v1853_v2 = vrot.slane %v1851_v11, 4  ;;  %1862 = vst.msk [vmem:[%s239_s18 + $0x8] sm:$0xf] %vm1861_vm13, %v1851_v11  ;;  %v1852_v14 = vrot.slane %v1849_v40, 4 }
 0x3bd   : > { %v1855_v27 = vsel %vm1854_vm14, %v1852_v14, %v1853_v2 }
 0x3be   : > { %v1857_v21 = vsel %vm864_vm5, %v1849_v40, %v1855_v27 }
 0x3bf   : > { %1860 = vst [vmem:[%s239_s18] sm:$0xff] %v1857_v21 }
 0x3c0   : > { %2321 = shalt.err (!%p2318_p8)
}
 0x3c1   : > { %s2322_s30 = scalar_lea.hbm %s2880_s21, 192  ;;  %s2326_s13 = scalar_lea.hbm %s2922_s6, 384 }
 0x3c2   : > { %p2323_p9 = scmp.ne.s32.totalorder %s2880_s21, %s2322_s30  ;;  %p2327_p0 = scmp.lt.s32.totalorder %s2880_s21, %s2922_s6 }
 0x3c3   : > { %p2328_p1 = scmp.lt.s32.totalorder %s2326_s13, %s2322_s30 }
 0x3c4   : > { %p2324_p12 = pnand %p2323_p9, %p2462_p10 }
 0x3c5   : > { %p2329_p2 = por %p2328_p1, %p2327_p0 }
 0x3c6   : > { %p2325_p13 = pneg %p2324_p12 }
 0x3c8   : > { %p2330_p3 = pnand %p2329_p2, %p2325_p13 }
 0x3ca   : > { %2333 = shalt.err (!%p2330_p3)
}
 0x3cb   : > { %2173 = dma.vmem_to_hbm [thread:$0]  (%p2462_p10), %s1879_s15, 192, %s2880_s21, %s1864_s29  }
 0x3cc PF: > { %p2179_p4 = scmp.ge.s32.totalorder %s2370_s28, 2  ;;  %s1890_s17 = sand.u32 1, %s2358_s26  }
 0x3cd   : > { %s1891_s18 = scalar_lea.sflag [#allocation5], %s1890_s17 }
 0x3ce   : > { %p2176_p5 = pnand %p2179_p4, %p2466_p11 }
 0x3d0   : > { %p2177_p6 = pneg %p2176_p5 }
 0x3d2   : > { %2353 = dma.done.wait (%p2177_p6), %s1891_s18, 192  }
 0x3d3   : > { %2355 = vsyncadd (%p2177_p6), %s1891_s18, 4294967104  ;;  %p22_p7 = scmp.ge.s32.totalorder %s2449_s7, 4   ;;  %s2939_s26 = smov %s2362_s27 }
 0x3d4   : > { %s2940_s27 = smov %s2366_s0  ;;  %s2941_s0 = smov %s2460_s10 }
 0x3d5   : > { %s2942_s28 = smov %s2449_s7  ;;  %24 = sbr.rel (!%p22_p7) target bundleno = 18 (0x12), region = 86 }
 0x3da   :  { %1896 = vsyncpa [#allocation5], 1 }
 0x3db   :  { %1898 = vsyncpa [#allocation5 + $0x1], 1 }

</bundles_post_ra>
